<compile_context>
chip_gen: v7x
topology: tpu7x:2x2x1
jax: 0.10.0
libtpu: 0.0.40
codegen_flags: <defaults>
</compile_context>

<pallas_src>
import jax
import jax.numpy as jnp
import numpy as np
from jax import lax
from jax.experimental import pallas as pl
from jax.experimental.pallas import tpu as pltpu

_DEF_BLOCK_ELEMS = 65536   # elements per streamed tile (256 KiB/buffer for f32)


def _num_tensorcores():
    """Best-effort TensorCore-per-chip count (2 on v7x, 1 on v5e/v6e)."""
    try:
        info = pltpu.get_tpu_info()
    except Exception:
        return 1
    for attr in ("num_cores", "num_tensorcores", "tensorcores_per_chip",
                 "cores_per_chip", "num_cores_per_chip"):
        v = getattr(info, attr, None)
        if v is None:
            continue
        try:
            v = int(v)
        except Exception:
            continue
        if v >= 1:
            return v
    return 1


def _as_stream(x, block_elems):
    """Flatten x into a sublane/lane-dense 2-D view (no transpose, native dtype)
    and pick a tile geometry (rows, cols, block_cols, n_col_blocks)."""
    arr = jnp.asarray(x)
    n = int(arr.size)
    rows = 1
    for r in (8, 4, 2):
        if n % r == 0:
            rows = r
            break
    cols = n // rows
    view = arr.reshape(rows, cols)
    per_row = max(block_elems // rows, 128)
    if cols <= per_row:
        bc = cols                       # full-dim block (allowed even if not %128)
    else:
        bc = (per_row // 128) * 128     # lane-aligned tile; ragged tail is masked
    nb = int(pl.cdiv(cols, bc))
    return view, (rows, cols, bc, nb)


def _when_needed(needed, cond):
    """pl.when(cond) only when the guard is actually required, else run the body."""
    if needed:
        return pl.when(cond)
    return lambda body: body()


def _nerfw_call(coarse_v, tgt_v, fine_v, beta_v, ray_geo, weighted,
                side_views, side_geos, side_relu, scales, num_cores):
    """One fused pallas_call producing all partial loss sums (already linearly
    scaled by `scales`).  Returns a tuple of scalars (one per loss term)."""
    Rr, Cr, BCr, nbr = ray_geo
    with_fine = fine_v is not None
    assert (not weighted) or with_fine
    n_side = len(side_views)
    n_ray_out = 1 + (1 if with_fine else 0) + (1 if weighted else 0)
    n_out = n_ray_out + n_side
    assert len(scales) == n_out and len(side_geos) == n_side == len(side_relu)

    nb_max = max([nbr] + [g[3] for g in side_geos])
    P = 2 if (num_cores >= 2 and nb_max >= 2) else 1   # 2-way only on multi-TC chips
    J = int(pl.cdiv(nb_max, P))

    def ray_map(p, j):
        # Clamp so the grid never DMAs out of bounds; duplicated / partial blocks
        # are masked (and compute-skipped) inside the kernel via the UNclamped index.
        return (0, jnp.minimum(p * J + j, nbr - 1))

    operands = [coarse_v]
    in_specs = [pl.BlockSpec((Rr, BCr), ray_map)]
    if with_fine:
        operands.append(fine_v)
        in_specs.append(pl.BlockSpec((Rr, BCr), ray_map))
    operands.append(tgt_v)
    in_specs.append(pl.BlockSpec((Rr, BCr), ray_map))
    if weighted:
        operands.append(beta_v)
        in_specs.append(pl.BlockSpec((Rr, BCr), ray_map))
    for v, g in zip(side_views, side_geos):
        def smap(p, j, _nb=g[3]):
            return (0, jnp.minimum(p * J + j, _nb - 1))
        operands.append(v)
        in_specs.append(pl.BlockSpec((g[0], g[2]), smap))
    n_in = len(operands)

    out_specs = tuple(pl.BlockSpec((1, 1, 128), lambda p, j: (p, 0, 0))
                      for _ in range(n_out))
    out_shapes = tuple(jax.ShapeDtypeStruct((P, 1, 128), jnp.float32)
                       for _ in range(n_out))
    scratch_shapes = ([pltpu.VMEM((Rr, BCr), jnp.float32)] * n_ray_out
                      + [pltpu.VMEM((g[0], g[2]), jnp.float32) for g in side_geos])

    def kernel(*refs):
        ray_refs = refs[:n_in - n_side]
        side_refs = refs[n_in - n_side:n_in]
        out_refs = refs[n_in:n_in + n_out]
        acc_refs = refs[n_in + n_out:]

        pos = 0
        coarse_ref = ray_refs[pos]; pos += 1
        fine_ref = ray_refs[pos] if with_fine else None
        pos += 1 if with_fine else 0
        tgt_ref = ray_refs[pos]; pos += 1
        beta_ref = ray_refs[pos] if weighted else None

        p = pl.program_id(0)
        j = pl.program_id(1)
        jj = p * J + j          # UNclamped column-block index (pairs with the clamp
                                # in the index_maps; masks/guards below use jj).

        @pl.when(j == 0)
        def _init():
            for a in acc_refs:
                a[...] = jnp.zeros_like(a)

        # ------------------------- ray-indexed terms -------------------------
        @_when_needed(P * J > nbr, jj < nbr)
        def _ray():
            lane = lax.broadcasted_iota(jnp.int32, (1, BCr), 1)
            valid = (jj * BCr + lane) < Cr
            tgt = tgt_ref[...].astype(jnp.float32)        # native dtype in HBM,
            dc = jnp.where(valid, coarse_ref[...].astype(jnp.float32) - tgt, 0.0)
            acc_refs[0][...] += dc * dc                   # upcast in-register only
            if with_fine:
                df = jnp.where(valid, fine_ref[...].astype(jnp.float32) - tgt, 0.0)
                if weighted:
                    b = jnp.where(valid, beta_ref[...].astype(jnp.float32), 1.0)
                    # exact reciprocal; divide cost is hidden under HBM streaming
                    inv_b2 = pl.reciprocal(b * b, approx=False)
                    acc_refs[1][...] += (df * df) * inv_b2
                    acc_refs[2][...] += jnp.log(b)        # log(1)=0 in masked lanes
                else:
                    acc_refs[1][...] += df * df

        # ----------------- fused 1-D side reductions (means) -----------------
        for s in range(n_side):
            _, Cs, BCs, nbs = side_geos[s]

            @_when_needed(P * J > nbs, jj < nbs)
            def _side(sref=side_refs[s], aref=acc_refs[n_ray_out + s],
                      Cs=Cs, BCs=BCs, relu=side_relu[s]):
                lane = lax.broadcasted_iota(jnp.int32, (1, BCs), 1)
                valid = (jj * BCs + lane) < Cs
                v = jnp.where(valid, sref[...].astype(jnp.float32), 0.0)
                if relu:
                    v = jnp.maximum(v, 0.0)
                aref[...] += v

        # --------------------------- in-kernel finalize ---------------------------
        @pl.when(j == J - 1)
        def _fin():
            for o, a, sc in zip(out_refs, acc_refs, scales):
                o[...] = jnp.broadcast_to(jnp.sum(a[...]) * sc, (1, 1, 128))

    bytes_in = sum(int(a.size) * a.dtype.itemsize for a in operands)
    ray_elems = Rr * Cr
    cost = pl.CostEstimate(
        flops=int(8 * ray_elems * (1 + int(with_fine))
                  + 2 * sum(g[0] * g[1] for g in side_geos)),
        transcendentals=int(2 * ray_elems) if weighted else 0,
        bytes_accessed=int(bytes_in + n_out * P * 128 * 4))

    outs = pl.pallas_call(
        kernel,
        out_shape=out_shapes,
        grid_spec=pltpu.PrefetchScalarGridSpec(
            num_scalar_prefetch=0,
            grid=(P, J),
            in_specs=in_specs,
            out_specs=out_specs,
            scratch_shapes=scratch_shapes,
        ),
        compiler_params=pltpu.CompilerParams(
            dimension_semantics=("parallel", "arbitrary")),
        cost_estimate=cost,
    )(*operands)
    if not isinstance(outs, (list, tuple)):
        outs = (outs,)
    # Each (P,1,128) row holds one core's scaled partial sum (replicated across
    # lanes); the only wrapper-side reduction left is this <=2-element add.
    return tuple(jnp.sum(o[:, 0, 0]) for o in outs)


# ---------------------------------------------------------------------------
# NerfWLoss forward (mirrors the PyTorch branching exactly), single launch.
# ---------------------------------------------------------------------------
def nerfw_loss(inputs, targets, coef=1.0, lambda_u=0.01,
               block_elems=_DEF_BLOCK_ELEMS, num_cores=None):
    if num_cores is None:
        num_cores = _num_tensorcores()
    coef = float(coef)
    lambda_u = float(lambda_u)

    tgt = jnp.asarray(targets)                       # native dtype, no transpose/cast
    coarse = jnp.asarray(inputs['rgb_coarse'])
    n_ray = int(tgt.size)                            # N * 3

    coarse_v, ray_geo = _as_stream(coarse, block_elems)
    Rr, Cr, _, _ = ray_geo
    tgt_v = tgt.reshape(Rr, Cr)

    ret = {}
    if 'rgb_fine' not in inputs:
        (c_s,) = _nerfw_call(coarse_v, tgt_v, None, None, ray_geo, False,
                             [], [], [], [0.5 * coef / n_ray], num_cores)
        ret['c_l'] = c_s
        return ret

    fine_v = jnp.asarray(inputs['rgb_fine']).reshape(Rr, Cr)

    if 'direct_fine' in inputs:
        beta_b = jnp.asarray(inputs['beta_b'])
        b_inf = jnp.asarray(inputs['B_inf'])
        sigma_f = jnp.asarray(inputs['sigma_fine'])
        bb_v, bb_g = _as_stream(beta_b, block_elems)
        bi_v, bi_g = _as_stream(b_inf, block_elems)
        sf_v, sf_g = _as_stream(sigma_f, block_elems)
        scales = [0.5 * coef / n_ray,                     # c_l
                  0.5 * coef / n_ray,                     # f_l (unweighted)
                  -0.5 * coef / int(beta_b.size),         # beta  (relu-mean)
                  -0.5 * coef / int(b_inf.size),          # B_inf (relu-mean)
                  lambda_u * coef / int(sigma_f.size)]    # s_f
        c_s, f_s, bb_s, bi_s, sf_s = _nerfw_call(
            coarse_v, tgt_v, fine_v, None, ray_geo, False,
            [bb_v, bi_v, sf_v], [bb_g, bi_g, sf_g], [True, True, False],
            scales, num_cores)
        ret.update(c_l=c_s, f_l=f_s, beta=bb_s, B_inf=bi_s, s_f=sf_s)
        return ret

    # Weighted-beta (standard NeRF-W) path; a KeyError on missing 'beta' matches
    # the PyTorch module's behavior.
    beta = jnp.asarray(inputs['beta'])
    # One small broadcast write (|targets| elements) instead of transposing three
    # big arrays; sum(log(beta_bc)) = C * sum(log(beta)), folded into the scale.
    beta_v = jnp.broadcast_to(jnp.expand_dims(beta, -1), tgt.shape).reshape(Rr, Cr)
    tsig = jnp.asarray(inputs['transient_sigmas'])
    ts_v, ts_g = _as_stream(tsig, block_elems)
    scales = [0.5 * coef / n_ray,                    # c_l
              0.5 * coef / n_ray,                    # f_l : sum((f-t)^2 / beta^2) / (2*3N)
              coef / n_ray,                          # linear part of b_l (log over x3 bcast)
              lambda_u * coef / int(tsig.size)]      # s_l
    c_s, f_s, lb_s, sl_s = _nerfw_call(
        coarse_v, tgt_v, fine_v, beta_v, ray_geo, True,
        [ts_v], [ts_g], [False], scales, num_cores)
    ret.update(c_l=c_s, f_l=f_s, b_l=coef * 3.0 + lb_s, s_l=sl_s)
    return ret


# Pure-JAX reference (mirrors the PyTorch module) for validation.
def nerfw_loss_ref(inputs, targets, coef=1.0, lambda_u=0.01):
    ret = {}
    t = jnp.asarray(targets, jnp.float32)
    ret['c_l'] = 0.5 * jnp.mean((jnp.asarray(inputs['rgb_coarse'], jnp.float32) - t) ** 2)
    if 'rgb_fine' in inputs:
        rf = jnp.asarray(inputs['rgb_fine'], jnp.float32)
        if 'beta' not in inputs:
            ret['f_l'] = 0.5 * jnp.mean((rf - t) ** 2)
        if 'direct_fine' in inputs:
            ret['f_l'] = 0.5 * jnp.mean((rf - t) ** 2)
            ret['beta'] = -0.5 * jnp.mean(jnp.maximum(jnp.asarray(inputs['beta_b'], jnp.float32), 0.0))
            ret['B_inf'] = -0.5 * jnp.mean(jnp.maximum(jnp.asarray(inputs['B_inf'], jnp.float32), 0.0))
            ret['s_f'] = lambda_u * jnp.mean(jnp.asarray(inputs['sigma_fine'], jnp.float32))
        else:
            beta = jnp.asarray(inputs['beta'], jnp.float32)
            ret['f_l'] = jnp.mean((rf - t) ** 2 / (2.0 * beta[:, None] ** 2))
            ret['b_l'] = 3.0 + jnp.mean(jnp.log(beta))
            ret['s_l'] = lambda_u * jnp.mean(jnp.asarray(inputs['transient_sigmas'], jnp.float32))
    return {k: coef * v for k, v in ret.items()}


def _check(out, ref, rtol=1e-4, atol=1e-5):
    assert set(out.keys()) == set(ref.keys()), (sorted(out.keys()), sorted(ref.keys()))
    for k in ref:
        np.testing.assert_allclose(np.asarray(out[k]), np.asarray(ref[k]),
                                   rtol=rtol, atol=atol, err_msg=k)


if __name__ == "__main__":
    key = jax.random.PRNGKey(0)
    ks = jax.random.split(key, 12)

    # Case 1: standard NeRF-W path (weighted beta + transient_sigmas), f32, one launch.
    N, S = 256, 8
    rgb_coarse = jax.random.uniform(ks[0], (N, 3), jnp.float32)
    rgb_fine = jax.random.uniform(ks[1], (N, 3), jnp.float32)
    targets = jax.random.uniform(ks[2], (N, 3), jnp.float32)
    beta = jax.random.uniform(ks[3], (N,), jnp.float32, minval=0.1, maxval=1.0)
    tsig = jax.random.uniform(ks[4], (N * S,), jnp.float32)
    in1 = {'rgb_coarse': rgb_coarse, 'rgb_fine': rgb_fine,
           'beta': beta, 'transient_sigmas': tsig}
    out1 = nerfw_loss(in1, targets)
    jax.block_until_ready(out1)
    _check(out1, nerfw_loss_ref(in1, targets))

    # Case 1b: same path with native bf16 ray inputs (no wrapper-side f32 cast).
    in1b = {'rgb_coarse': rgb_coarse.astype(jnp.bfloat16),
            'rgb_fine': rgb_fine.astype(jnp.bfloat16),
            'beta': beta, 'transient_sigmas': tsig}
    tgt_bf16 = targets.astype(jnp.bfloat16)
    out1b = nerfw_loss(in1b, tgt_bf16)
    jax.block_until_ready(out1b)
    _check(out1b, nerfw_loss_ref(in1b, tgt_bf16))

    # Case 2: multi-block tiled + masked path (columns not a multiple of the tile,
    # duplicated/short blocks, forced 2-way core split), small tiles to exercise
    # the grid machinery.
    N2, S2 = 1000, 8
    rc2 = jax.random.uniform(ks[5], (N2, 3), jnp.float32)
    rf2 = jax.random.uniform(ks[6], (N2, 3), jnp.float32)
    tg2 = jax.random.uniform(ks[7], (N2, 3), jnp.float32)
    b2 = jax.random.uniform(ks[8], (N2,), jnp.float32, minval=0.1, maxval=1.0)
    ts2 = jax.random.uniform(ks[9], (N2 * S2,), jnp.float32)
    in2 = {'rgb_coarse': rc2, 'rgb_fine': rf2, 'beta': b2, 'transient_sigmas': ts2}
    out2 = nerfw_loss(in2, tg2, coef=2.0, lambda_u=0.05,
                      block_elems=1024, num_cores=2)
    jax.block_until_ready(out2)
    _check(out2, nerfw_loss_ref(in2, tg2, coef=2.0, lambda_u=0.05))

    # Case 3: 'direct_fine' branch (unweighted fine + relu/means) with odd sizes
    # exercising the non-multiple-of-8 view fallback, all fused in one launch.
    N3, S3 = 27, 8
    rc3 = jax.random.uniform(ks[0], (N3, 3), jnp.float32)
    rf3 = jax.random.uniform(ks[1], (N3, 3), jnp.float32)
    tg3 = jax.random.uniform(ks[2], (N3, 3), jnp.float32)
    in3 = {'rgb_coarse': rc3, 'rgb_fine': rf3, 'direct_fine': rf3,
           'beta_b': jax.random.normal(ks[10], (N3,), jnp.float32),
           'B_inf': jax.random.normal(ks[11], (N3,), jnp.float32),
           'sigma_fine': jax.random.uniform(ks[4], (N3 * S3,), jnp.float32)}
    out3 = nerfw_loss(in3, tg3)
    jax.block_until_ready(out3)
    _check(out3, nerfw_loss_ref(in3, tg3))

    # Case 4: coarse-only.
    out4 = nerfw_loss({'rgb_coarse': rgb_coarse}, targets)
    jax.block_until_ready(out4)
    _check(out4, nerfw_loss_ref({'rgb_coarse': rgb_coarse}, targets))

    print("KERNEL_OK")
</pallas_src>

<mosaic_0001>
module attributes {stable_mosaic.version = 11 : i64} {
  func.func @kernel(%arg0: i32, %arg1: i32, %arg2: memref<8x96xf32, #tpu.memory_space<vmem>>, %arg3: memref<8x96xf32, #tpu.memory_space<vmem>>, %arg4: memref<8x96xf32, #tpu.memory_space<vmem>>, %arg5: memref<8x96xf32, #tpu.memory_space<vmem>>, %arg6: memref<8x256xf32, #tpu.memory_space<vmem>>, %arg7: memref<1x1x128xf32, #tpu.memory_space<vmem>>, %arg8: memref<1x1x128xf32, #tpu.memory_space<vmem>>, %arg9: memref<1x1x128xf32, #tpu.memory_space<vmem>>, %arg10: memref<1x1x128xf32, #tpu.memory_space<vmem>>, %arg11: memref<8x96xf32, #tpu.memory_space<vmem>>, %arg12: memref<8x96xf32, #tpu.memory_space<vmem>>, %arg13: memref<8x96xf32, #tpu.memory_space<vmem>>, %arg14: memref<8x256xf32, #tpu.memory_space<vmem>>) attributes {dimension_semantics = [#tpu.dimension_semantics<parallel>, #tpu.dimension_semantics<arbitrary>], iteration_bounds = array<i64: 1, 1>, scalar_prefetch = 0 : i64, scratch_operands = 4 : i64, tpu.core_type = #tpu.core_type<tc>, window_params = [{transform_indices = @transform_0, window_bounds = array<i64: 8, 96>}, {transform_indices = @transform_1, window_bounds = array<i64: 8, 96>}, {transform_indices = @transform_2, window_bounds = array<i64: 8, 96>}, {transform_indices = @transform_3, window_bounds = array<i64: 8, 96>}, {transform_indices = @transform_4, window_bounds = array<i64: 8, 256>}, {transform_indices = @transform_5, window_bounds = array<i64: 1, 1, 128>}, {transform_indices = @transform_6, window_bounds = array<i64: 1, 1, 128>}, {transform_indices = @transform_7, window_bounds = array<i64: 1, 1, 128>}, {transform_indices = @transform_8, window_bounds = array<i64: 1, 1, 128>}]} {
    %c1_i32 = arith.constant 1 : i32
    %0 = arith.muli %arg0, %c1_i32 : i32
    %1 = arith.addi %0, %arg1 : i32
    %c0_i32 = arith.constant 0 : i32
    %2 = arith.cmpi eq, %arg1, %c0_i32 : i32
    %3 = arith.extui %2 : i1 to i32
    %c0_i32_0 = arith.constant 0 : i32
    %4 = arith.cmpi ne, %3, %c0_i32_0 : i32
    scf.if %4 {
      %cst_33 = arith.constant 0.000000e+00 : f32
      %61 = vector.broadcast %cst_33 : f32 to vector<8x96xf32>
      %c0_34 = arith.constant 0 : index
      %c0_35 = arith.constant 0 : index
      %62 = vector.load %arg11[%c0_34, %c0_35] : memref<8x96xf32, #tpu.memory_space<vmem>>, vector<8x96xf32>
      tpu.vector_store %arg11[%c0_34, %c0_35], %61 {strides = array<i32>} : memref<8x96xf32, #tpu.memory_space<vmem>>, vector<8x96xf32>,
      %cst_36 = arith.constant 0.000000e+00 : f32
      %63 = vector.broadcast %cst_36 : f32 to vector<8x96xf32>
      %c0_37 = arith.constant 0 : index
      %c0_38 = arith.constant 0 : index
      %64 = vector.load %arg12[%c0_37, %c0_38] : memref<8x96xf32, #tpu.memory_space<vmem>>, vector<8x96xf32>
      tpu.vector_store %arg12[%c0_37, %c0_38], %63 {strides = array<i32>} : memref<8x96xf32, #tpu.memory_space<vmem>>, vector<8x96xf32>,
      %cst_39 = arith.constant 0.000000e+00 : f32
      %65 = vector.broadcast %cst_39 : f32 to vector<8x96xf32>
      %c0_40 = arith.constant 0 : index
      %c0_41 = arith.constant 0 : index
      %66 = vector.load %arg13[%c0_40, %c0_41] : memref<8x96xf32, #tpu.memory_space<vmem>>, vector<8x96xf32>
      tpu.vector_store %arg13[%c0_40, %c0_41], %65 {strides = array<i32>} : memref<8x96xf32, #tpu.memory_space<vmem>>, vector<8x96xf32>,
      %cst_42 = arith.constant 0.000000e+00 : f32
      %67 = vector.broadcast %cst_42 : f32 to vector<8x256xf32>
      %c0_43 = arith.constant 0 : index
      %c0_44 = arith.constant 0 : index
      %68 = vector.load %arg14[%c0_43, %c0_44] : memref<8x256xf32, #tpu.memory_space<vmem>>, vector<8x256xf32>
      tpu.vector_store %arg14[%c0_43, %c0_44], %67 {strides = array<i32>} : memref<8x256xf32, #tpu.memory_space<vmem>>, vector<8x256xf32>,
    } else {
    }
    %5 = tpu.iota {dimensions = array<i32: 1>} : vector<1x96xi32>
    %c96_i32 = arith.constant 96 : i32
    %6 = arith.muli %1, %c96_i32 : i32
    %7 = vector.broadcast %6 : i32 to vector<1x96xi32>
    %8 = arith.addi %7, %5 : vector<1x96xi32>
    %c96_i32_1 = arith.constant 96 : i32
    %9 = vector.broadcast %c96_i32_1 : i32 to vector<1x96xi32>
    %10 = arith.cmpi slt, %8, %9 : vector<1x96xi32>
    %c0 = arith.constant 0 : index
    %c0_2 = arith.constant 0 : index
    %11 = vector.load %arg4[%c0, %c0_2] : memref<8x96xf32, #tpu.memory_space<vmem>>, vector<8x96xf32>
    %c0_3 = arith.constant 0 : index
    %c0_4 = arith.constant 0 : index
    %12 = vector.load %arg2[%c0_3, %c0_4] : memref<8x96xf32, #tpu.memory_space<vmem>>, vector<8x96xf32>
    %13 = arith.subf %12, %11 : vector<8x96xf32>
    %cst = arith.constant 0.000000e+00 : f32
    %14 = vector.shape_cast %10 : vector<1x96xi1> to vector<1x96xi1>
    %15 = vector.broadcast %14 : vector<1x96xi1> to vector<8x96xi1>
    %16 = vector.broadcast %cst : f32 to vector<8x96xf32>
    %17 = arith.select %15, %13, %16 : vector<8x96xi1>, vector<8x96xf32>
    %c0_5 = arith.constant 0 : index
    %c0_6 = arith.constant 0 : index
    %18 = vector.load %arg11[%c0_5, %c0_6] : memref<8x96xf32, #tpu.memory_space<vmem>>, vector<8x96xf32>
    %19 = arith.mulf %17, %17 : vector<8x96xf32>
    %20 = arith.addf %18, %19 : vector<8x96xf32>
    %c0_7 = arith.constant 0 : index
    %c0_8 = arith.constant 0 : index
    %21 = vector.load %arg11[%c0_7, %c0_8] : memref<8x96xf32, #tpu.memory_space<vmem>>, vector<8x96xf32>
    tpu.vector_store %arg11[%c0_7, %c0_8], %20 {strides = array<i32>} : memref<8x96xf32, #tpu.memory_space<vmem>>, vector<8x96xf32>,
    %c0_9 = arith.constant 0 : index
    %c0_10 = arith.constant 0 : index
    %22 = vector.load %arg3[%c0_9, %c0_10] : memref<8x96xf32, #tpu.memory_space<vmem>>, vector<8x96xf32>
    %23 = arith.subf %22, %11 : vector<8x96xf32>
    %cst_11 = arith.constant 0.000000e+00 : f32
    %24 = vector.shape_cast %10 : vector<1x96xi1> to vector<1x96xi1>
    %25 = vector.broadcast %24 : vector<1x96xi1> to vector<8x96xi1>
    %26 = vector.broadcast %cst_11 : f32 to vector<8x96xf32>
    %27 = arith.select %25, %23, %26 : vector<8x96xi1>, vector<8x96xf32>
    %c0_12 = arith.constant 0 : index
    %c0_13 = arith.constant 0 : index
    %28 = vector.load %arg5[%c0_12, %c0_13] : memref<8x96xf32, #tpu.memory_space<vmem>>, vector<8x96xf32>
    %cst_14 = arith.constant 1.000000e+00 : f32
    %29 = vector.shape_cast %10 : vector<1x96xi1> to vector<1x96xi1>
    %30 = vector.broadcast %29 : vector<1x96xi1> to vector<8x96xi1>
    %31 = vector.broadcast %cst_14 : f32 to vector<8x96xf32>
    %32 = arith.select %30, %28, %31 : vector<8x96xi1>, vector<8x96xf32>
    %33 = arith.mulf %32, %32 : vector<8x96xf32>
    %34 = tpu.reciprocal %33 : vector<8x96xf32> -> vector<8x96xf32>
    %c0_15 = arith.constant 0 : index
    %c0_16 = arith.constant 0 : index
    %35 = vector.load %arg12[%c0_15, %c0_16] : memref<8x96xf32, #tpu.memory_space<vmem>>, vector<8x96xf32>
    %36 = arith.mulf %27, %27 : vector<8x96xf32>
    %37 = arith.mulf %36, %34 : vector<8x96xf32>
    %38 = arith.addf %35, %37 : vector<8x96xf32>
    %c0_17 = arith.constant 0 : index
    %c0_18 = arith.constant 0 : index
    %39 = vector.load %arg12[%c0_17, %c0_18] : memref<8x96xf32, #tpu.memory_space<vmem>>, vector<8x96xf32>
    tpu.vector_store %arg12[%c0_17, %c0_18], %38 {strides = array<i32>} : memref<8x96xf32, #tpu.memory_space<vmem>>, vector<8x96xf32>,
    %c0_19 = arith.constant 0 : index
    %c0_20 = arith.constant 0 : index
    %40 = vector.load %arg13[%c0_19, %c0_20] : memref<8x96xf32, #tpu.memory_space<vmem>>, vector<8x96xf32>
    %41 = math.log %32 : vector<8x96xf32>
    %42 = arith.addf %40, %41 : vector<8x96xf32>
    %c0_21 = arith.constant 0 : index
    %c0_22 = arith.constant 0 : index
    %43 = vector.load %arg13[%c0_21, %c0_22] : memref<8x96xf32, #tpu.memory_space<vmem>>, vector<8x96xf32>
    tpu.vector_store %arg13[%c0_21, %c0_22], %42 {strides = array<i32>} : memref<8x96xf32, #tpu.memory_space<vmem>>, vector<8x96xf32>,
    %44 = tpu.iota {dimensions = array<i32: 1>} : vector<1x256xi32>
    %c256_i32 = arith.constant 256 : i32
    %45 = arith.muli %1, %c256_i32 : i32
    %46 = vector.broadcast %45 : i32 to vector<1x256xi32>
    %47 = arith.addi %46, %44 : vector<1x256xi32>
    %c256_i32_23 = arith.constant 256 : i32
    %48 = vector.broadcast %c256_i32_23 : i32 to vector<1x256xi32>
    %49 = arith.cmpi slt, %47, %48 : vector<1x256xi32>
    %c0_24 = arith.constant 0 : index
    %c0_25 = arith.constant 0 : index
    %50 = vector.load %arg6[%c0_24, %c0_25] : memref<8x256xf32, #tpu.memory_space<vmem>>, vector<8x256xf32>
    %cst_26 = arith.constant 0.000000e+00 : f32
    %51 = vector.shape_cast %49 : vector<1x256xi1> to vector<1x256xi1>
    %52 = vector.broadcast %51 : vector<1x256xi1> to vector<8x256xi1>
    %53 = vector.broadcast %cst_26 : f32 to vector<8x256xf32>
    %54 = arith.select %52, %50, %53 : vector<8x256xi1>, vector<8x256xf32>
    %c0_27 = arith.constant 0 : index
    %c0_28 = arith.constant 0 : index
    %55 = vector.load %arg14[%c0_27, %c0_28] : memref<8x256xf32, #tpu.memory_space<vmem>>, vector<8x256xf32>
    %56 = arith.addf %55, %54 : vector<8x256xf32>
    %c0_29 = arith.constant 0 : index
    %c0_30 = arith.constant 0 : index
    %57 = vector.load %arg14[%c0_29, %c0_30] : memref<8x256xf32, #tpu.memory_space<vmem>>, vector<8x256xf32>
    tpu.vector_store %arg14[%c0_29, %c0_30], %56 {strides = array<i32>} : memref<8x256xf32, #tpu.memory_space<vmem>>, vector<8x256xf32>,
    %c0_i32_31 = arith.constant 0 : i32
    %58 = arith.cmpi eq, %arg1, %c0_i32_31 : i32
    %59 = arith.extui %58 : i1 to i32
    %c0_i32_32 = arith.constant 0 : i32
    %60 = arith.cmpi ne, %59, %c0_i32_32 : i32
    scf.if %60 {
      %c0_33 = arith.constant 0 : index
      %c0_34 = arith.constant 0 : index
      %61 = vector.load %arg11[%c0_33, %c0_34] : memref<8x96xf32, #tpu.memory_space<vmem>>, vector<8x96xf32>
      %62 = vector.shape_cast %61 : vector<8x96xf32> to vector<1x8x96xf32>
      %cst_35 = arith.constant dense<0.000000e+00> : vector<1xf32>
      %63 = vector.multi_reduction <add>, %62, %cst_35 [1, 2] : vector<1x8x96xf32> to vector<1xf32>
      %64 = vector.shape_cast %63 : vector<1xf32> to vector<1x1x1xf32>
      %65 = vector.extract %64[0, 0, 0] : f32 from vector<1x1x1xf32>
      %cst_36 = arith.constant 6.51041686E-4 : f32
      %66 = arith.mulf %65, %cst_36 : f32
      %67 = vector.broadcast %66 : f32 to vector<1x1x128xf32>
      %c0_37 = arith.constant 0 : index
      %c0_38 = arith.constant 0 : index
      %c0_39 = arith.constant 0 : index
      %68 = vector.load %arg7[%c0_37, %c0_38, %c0_39] : memref<1x1x128xf32, #tpu.memory_space<vmem>>, vector<1x1x128xf32>
      tpu.vector_store %arg7[%c0_37, %c0_38, %c0_39], %67 {strides = array<i32>} : memref<1x1x128xf32, #tpu.memory_space<vmem>>, vector<1x1x128xf32>,
      %c0_40 = arith.constant 0 : index
      %c0_41 = arith.constant 0 : index
      %69 = vector.load %arg12[%c0_40, %c0_41] : memref<8x96xf32, #tpu.memory_space<vmem>>, vector<8x96xf32>
      %70 = vector.shape_cast %69 : vector<8x96xf32> to vector<1x8x96xf32>
      %cst_42 = arith.constant dense<0.000000e+00> : vector<1xf32>
      %71 = vector.multi_reduction <add>, %70, %cst_42 [1, 2] : vector<1x8x96xf32> to vector<1xf32>
      %72 = vector.shape_cast %71 : vector<1xf32> to vector<1x1x1xf32>
      %73 = vector.extract %72[0, 0, 0] : f32 from vector<1x1x1xf32>
      %cst_43 = arith.constant 6.51041686E-4 : f32
      %74 = arith.mulf %73, %cst_43 : f32
      %75 = vector.broadcast %74 : f32 to vector<1x1x128xf32>
      %c0_44 = arith.constant 0 : index
      %c0_45 = arith.constant 0 : index
      %c0_46 = arith.constant 0 : index
      %76 = vector.load %arg8[%c0_44, %c0_45, %c0_46] : memref<1x1x128xf32, #tpu.memory_space<vmem>>, vector<1x1x128xf32>
      tpu.vector_store %arg8[%c0_44, %c0_45, %c0_46], %75 {strides = array<i32>} : memref<1x1x128xf32, #tpu.memory_space<vmem>>, vector<1x1x128xf32>,
      %c0_47 = arith.constant 0 : index
      %c0_48 = arith.constant 0 : index
      %77 = vector.load %arg13[%c0_47, %c0_48] : memref<8x96xf32, #tpu.memory_space<vmem>>, vector<8x96xf32>
      %78 = vector.shape_cast %77 : vector<8x96xf32> to vector<1x8x96xf32>
      %cst_49 = arith.constant dense<0.000000e+00> : vector<1xf32>
      %79 = vector.multi_reduction <add>, %78, %cst_49 [1, 2] : vector<1x8x96xf32> to vector<1xf32>
      %80 = vector.shape_cast %79 : vector<1xf32> to vector<1x1x1xf32>
      %81 = vector.extract %80[0, 0, 0] : f32 from vector<1x1x1xf32>
      %cst_50 = arith.constant 0.00130208337 : f32
      %82 = arith.mulf %81, %cst_50 : f32
      %83 = vector.broadcast %82 : f32 to vector<1x1x128xf32>
      %c0_51 = arith.constant 0 : index
      %c0_52 = arith.constant 0 : index
      %c0_53 = arith.constant 0 : index
      %84 = vector.load %arg9[%c0_51, %c0_52, %c0_53] : memref<1x1x128xf32, #tpu.memory_space<vmem>>, vector<1x1x128xf32>
      tpu.vector_store %arg9[%c0_51, %c0_52, %c0_53], %83 {strides = array<i32>} : memref<1x1x128xf32, #tpu.memory_space<vmem>>, vector<1x1x128xf32>,
      %c0_54 = arith.constant 0 : index
      %c0_55 = arith.constant 0 : index
      %85 = vector.load %arg14[%c0_54, %c0_55] : memref<8x256xf32, #tpu.memory_space<vmem>>, vector<8x256xf32>
      %86 = vector.shape_cast %85 : vector<8x256xf32> to vector<1x8x256xf32>
      %cst_56 = arith.constant dense<0.000000e+00> : vector<1xf32>
      %87 = vector.multi_reduction <add>, %86, %cst_56 [1, 2] : vector<1x8x256xf32> to vector<1xf32>
      %88 = vector.shape_cast %87 : vector<1xf32> to vector<1x1x1xf32>
      %89 = vector.extract %88[0, 0, 0] : f32 from vector<1x1x1xf32>
      %cst_57 = arith.constant 4.88281239E-6 : f32
      %90 = arith.mulf %89, %cst_57 : f32
      %91 = vector.broadcast %90 : f32 to vector<1x1x128xf32>
      %c0_58 = arith.constant 0 : index
      %c0_59 = arith.constant 0 : index
      %c0_60 = arith.constant 0 : index
      %92 = vector.load %arg10[%c0_58, %c0_59, %c0_60] : memref<1x1x128xf32, #tpu.memory_space<vmem>>, vector<1x1x128xf32>
      tpu.vector_store %arg10[%c0_58, %c0_59, %c0_60], %91 {strides = array<i32>} : memref<1x1x128xf32, #tpu.memory_space<vmem>>, vector<1x1x128xf32>,
    } else {
    }
    return
  }
  func.func @transform_0(%arg0: i32, %arg1: i32) -> (i32, i32) {
    %c1_i32 = arith.constant 1 : i32
    %0 = arith.muli %arg0, %c1_i32 : i32
    %1 = arith.addi %0, %arg1 : i32
    %c0_i32 = arith.constant 0 : i32
    %2 = arith.minsi %1, %c0_i32 : i32
    %c0_i32_0 = arith.constant 0 : i32
    %c0_i32_1 = arith.constant 0 : i32
    return %c0_i32_0, %2 : i32, i32
  }
  func.func @transform_1(%arg0: i32, %arg1: i32) -> (i32, i32) {
    %c1_i32 = arith.constant 1 : i32
    %0 = arith.muli %arg0, %c1_i32 : i32
    %1 = arith.addi %0, %arg1 : i32
    %c0_i32 = arith.constant 0 : i32
    %2 = arith.minsi %1, %c0_i32 : i32
    %c0_i32_0 = arith.constant 0 : i32
    %c0_i32_1 = arith.constant 0 : i32
    return %c0_i32_0, %2 : i32, i32
  }
  func.func @transform_2(%arg0: i32, %arg1: i32) -> (i32, i32) {
    %c1_i32 = arith.constant 1 : i32
    %0 = arith.muli %arg0, %c1_i32 : i32
    %1 = arith.addi %0, %arg1 : i32
    %c0_i32 = arith.constant 0 : i32
    %2 = arith.minsi %1, %c0_i32 : i32
    %c0_i32_0 = arith.constant 0 : i32
    %c0_i32_1 = arith.constant 0 : i32
    return %c0_i32_0, %2 : i32, i32
  }
  func.func @transform_3(%arg0: i32, %arg1: i32) -> (i32, i32) {
    %c1_i32 = arith.constant 1 : i32
    %0 = arith.muli %arg0, %c1_i32 : i32
    %1 = arith.addi %0, %arg1 : i32
    %c0_i32 = arith.constant 0 : i32
    %2 = arith.minsi %1, %c0_i32 : i32
    %c0_i32_0 = arith.constant 0 : i32
    %c0_i32_1 = arith.constant 0 : i32
    return %c0_i32_0, %2 : i32, i32
  }
  func.func @transform_4(%arg0: i32, %arg1: i32) -> (i32, i32) {
    %c1_i32 = arith.constant 1 : i32
    %0 = arith.muli %arg0, %c1_i32 : i32
    %1 = arith.addi %0, %arg1 : i32
    %c0_i32 = arith.constant 0 : i32
    %2 = arith.minsi %1, %c0_i32 : i32
    %c0_i32_0 = arith.constant 0 : i32
    %c0_i32_1 = arith.constant 0 : i32
    return %c0_i32_0, %2 : i32, i32
  }
  func.func @transform_5(%arg0: i32, %arg1: i32) -> (i32, i32, i32) {
    %c0_i32 = arith.constant 0 : i32
    %c0_i32_0 = arith.constant 0 : i32
    %c0_i32_1 = arith.constant 0 : i32
    return %arg0, %c0_i32, %c0_i32_0 : i32, i32, i32
  }
  func.func @transform_6(%arg0: i32, %arg1: i32) -> (i32, i32, i32) {
    %c0_i32 = arith.constant 0 : i32
    %c0_i32_0 = arith.constant 0 : i32
    %c0_i32_1 = arith.constant 0 : i32
    return %arg0, %c0_i32, %c0_i32_0 : i32, i32, i32
  }
  func.func @transform_7(%arg0: i32, %arg1: i32) -> (i32, i32, i32) {
    %c0_i32 = arith.constant 0 : i32
    %c0_i32_0 = arith.constant 0 : i32
    %c0_i32_1 = arith.constant 0 : i32
    return %arg0, %c0_i32, %c0_i32_0 : i32, i32, i32
  }
  func.func @transform_8(%arg0: i32, %arg1: i32) -> (i32, i32, i32) {
    %c0_i32 = arith.constant 0 : i32
    %c0_i32_0 = arith.constant 0 : i32
    %c0_i32_1 = arith.constant 0 : i32
    return %arg0, %c0_i32, %c0_i32_0 : i32, i32, i32
  }
}

</mosaic_0001>

<bundles_post_ra>
// kernel: tpu_custom_call.1
= control target key start
LH: loop header
LB: loop body
LE: loop exit
PB: predicated region body
PF: predicated region fallthrough
CT: control target
= control target key end

     0   :  { %14 = vsyncpa [#allocation7], 0  ;;  %s731_s0 = inlined_call_operand.hbm [shape: f32[8,96], index: 0, kind: input, shape index: {}]   ;;  %s732_s1 = inlined_call_operand.hbm [shape: f32[8,96], index: 1, kind: input, shape index: {}]   ;;  %s733_s2 = inlined_call_operand.hbm [shape: f32[8,96], index: 2, kind: input, shape index: {}]   ;;  %s734_s3 = inlined_call_operand.vmem [shape: f32[8,96], index: 3, kind: input, shape index: {}]   ;;  %s735_s4 = inlined_call_operand.hbm [shape: f32[8,256], index: 4, kind: input, shape index: {}]   ;;  %s736_s5 = inlined_call_operand.hbm [shape: f32[1,1,128], index: 5, kind: output, shape index: {0}]   ;;  %s737_s6 = inlined_call_operand.hbm [shape: f32[1,1,128], index: 6, kind: output, shape index: {1}]   ;;  %s738_s7 = inlined_call_operand.hbm [shape: f32[1,1,128], index: 7, kind: output, shape index: {2}]   ;;  %s739_s8 = inlined_call_operand.hbm [shape: f32[1,1,128], index: 8, kind: output, shape index: {3}]  }
   0x1   :  { %15 = vsyncpa [#allocation10], 0 }
   0x2   :  { %16 = vsyncpa [#allocation13], 0 }
   0x3   :  { %17 = vsyncpa [#allocation8], 0 }
   0x4   :  { %18 = vsyncpa [#allocation16], 0 }
   0x5   :  { %19 = vsyncpa [#allocation19], 0  ;;  %s542_s27 = smov [#allocation9]   ;;  %s543_s29 = smov [#allocation6]  }
   0x6   :  { %s46_s28 = sshll.u32 %s542_s27, 4  ;;  %s31_s30 = sshll.u32 %s543_s29, 4  ;;  %s47_s28 = int_to_ptr.vmem [resolvable:$true] %s46_s28  ;;  %s32_s30 = int_to_ptr.vmem [resolvable:$true] %s31_s30 }
   0x7   :  { %s354_s11 = scalar_lea.hbm %s732_s1, 128 }
   0x8   :  { %p355_p0 = scmp.ne.s32.totalorder %s732_s1, %s354_s11  ;;  %p358_p1 = scmp.lt.u32.totalorder %s354_s11, %s732_s1 }
   0xa   :  { %p360_p2 = pnand %p358_p1, %p355_p0 }
   0xc   :  { %363 = shalt.err (!%p360_p2)
}
   0xd   :  { %s364_s16 = scalar_lea.vmem %s47_s28, 128  ;;  %p369_p4 = scmp.lt.s32.totalorder %s47_s28, %s47_s28 }
   0xe   :  { %p365_p3 = scmp.ne.s32.totalorder %s47_s28, %s364_s16  ;;  %p370_p5 = scmp.lt.s32.totalorder %s364_s16, %s364_s16 }
  0x10   :  { %p371_p6 = por %p370_p5, %p369_p4 }
  0x12   :  { %p372_p7 = pnand %p371_p6, %p365_p3 }
  0x14   :  { %375 = shalt.err (!%p372_p7)
}
  0x15   :  { %49 = dma.hbm_to_vmem [thread:$0]  %s732_s1, 128, %s47_s28, [#allocation10]  }
  0x16   :  { %s376_s21 = scalar_lea.hbm %s731_s0, 128 }
  0x17   :  { %p377_p8 = scmp.ne.s32.totalorder %s731_s0, %s376_s21  ;;  %p380_p9 = scmp.lt.u32.totalorder %s376_s21, %s731_s0 }
  0x19   :  { %p382_p10 = pnand %p380_p9, %p377_p8 }
  0x1b   :  { %385 = shalt.err (!%p382_p10)
}
  0x1c   :  { %s386_s26 = scalar_lea.vmem %s32_s30, 128  ;;  %p391_p12 = scmp.lt.s32.totalorder %s32_s30, %s32_s30 }
  0x1d   :  { %p387_p11 = scmp.ne.s32.totalorder %s32_s30, %s386_s26  ;;  %p392_p13 = scmp.lt.s32.totalorder %s386_s26, %s386_s26 }
  0x1f   :  { %p393_p0 = por %p392_p13, %p391_p12 }
  0x21   :  { %p394_p1 = pnand %p393_p0, %p387_p11 }
  0x23   :  { %397 = shalt.err (!%p394_p1)
}
  0x24   :  { %34 = dma.hbm_to_vmem [thread:$0]  %s731_s0, 128, %s32_s30, [#allocation7]  }
  0x25   :  { %s544_s28 = smov [#allocation11]   ;;  %s545_s9 = smov [#allocation12]  }
  0x26   :  { %s61_s29 = sshll.u32 %s544_s28, 4  ;;  %s89_s10 = sshll.u32 %s545_s9, 4  ;;  %s62_s29 = int_to_ptr.vmem [resolvable:$true] %s61_s29  ;;  %s90_s10 = int_to_ptr.vmem [resolvable:$true] %s89_s10 }
  0x27   :  { %s398_s13 = scalar_lea.hbm %s733_s2, 128 }
  0x28   :  { %p399_p2 = scmp.ne.s32.totalorder %s733_s2, %s398_s13  ;;  %p402_p3 = scmp.lt.u32.totalorder %s398_s13, %s733_s2 }
  0x2a   :  { %p404_p4 = pnand %p402_p3, %p399_p2 }
  0x2c   :  { %407 = shalt.err (!%p404_p4)
}
  0x2d   :  { %s408_s0 = scalar_lea.vmem %s62_s29, 128  ;;  %p413_p6 = scmp.lt.s32.totalorder %s62_s29, %s62_s29 }
  0x2e   :  { %p409_p5 = scmp.ne.s32.totalorder %s62_s29, %s408_s0  ;;  %p414_p7 = scmp.lt.s32.totalorder %s408_s0, %s408_s0 }
  0x30   :  { %p415_p8 = por %p414_p7, %p413_p6 }
  0x32   :  { %p416_p9 = pnand %p415_p8, %p409_p5 }
  0x34   :  { %419 = shalt.err (!%p416_p9)
}
  0x35   :  { %64 = dma.hbm_to_vmem [thread:$0]  %s733_s2, 128, %s62_s29, [#allocation10]  }
  0x36   :  { %s420_s21 = scalar_lea.hbm %s735_s4, 256 }
  0x37   :  { %p421_p10 = scmp.ne.s32.totalorder %s735_s4, %s420_s21  ;;  %p424_p11 = scmp.lt.u32.totalorder %s420_s21, %s735_s4 }
  0x39   :  { %p426_p12 = pnand %p424_p11, %p421_p10 }
  0x3b   :  { %429 = shalt.err (!%p426_p12)
}
  0x3c   :  { %s430_s26 = scalar_lea.vmem %s90_s10, 256  ;;  %p435_p0 = scmp.lt.s32.totalorder %s90_s10, %s90_s10 }
  0x3d   :  { %p431_p13 = scmp.ne.s32.totalorder %s90_s10, %s430_s26  ;;  %p436_p1 = scmp.lt.s32.totalorder %s430_s26, %s430_s26 }
  0x3f   :  { %p437_p2 = por %p436_p1, %p435_p0 }
  0x41   :  { %p438_p3 = pnand %p437_p2, %p431_p13 }
  0x43   :  { %441 = shalt.err (!%p438_p3)
}
  0x44   :  { %92 = dma.hbm_to_vmem [thread:$0]  %s735_s4, 256, %s90_s10, [#allocation13]  }
  0x45   :  { %530 = dma.done.wait [#allocation7], 128  }
  0x46   :  { %531 = vsyncadd [#allocation7], 4294967168 }
  0x47   :  { %532 = dma.done.wait [#allocation10], 256  }
  0x48   :  { %533 = vsyncadd [#allocation10], 4294967040 }
  0x49   :  { %534 = dma.done.wait [#allocation13], 256  }
  0x4a   :  { %535 = vsyncadd [#allocation13], 4294967040  ;;  %vm140_vm0 = vcmask 785408   ;;  %v146_v0 = vlaneseq  ;;  %v546_v1 = vmov 0.0   ;;  %v152_v3 = vld [vmem:[#allocation11] sm:$0xff]  ;;  %v153_v4 = vld [vmem:[#allocation6] sm:$0xff] }
  0x4b   :  { %141 = vst.msk [vmem:[#allocation2] sm:$0xff] %vm140_vm0, %v546_v1  ;;  %142 = vst.msk [vmem:[#allocation3] sm:$0xff] %vm140_vm0, %v546_v1  ;;  %v154_v5 = vsub.f32 %v153_v4, %v152_v3  ;;  %v166_v6 = vld [vmem:[%s734_s3] sm:$0xff]  ;;  %v187_v27 = vld [vmem:[#allocation12] sm:$0xff]  ;;  %s547_s3 = smov [#allocation14]  }
  0x4c   :  { %143 = vst.msk [vmem:[#allocation4] sm:$0xff] %vm140_vm0, %v546_v1  ;;  %v147_v2 = vand.u32 127, %v146_v0  ;;  %v163_v7 = vld [vmem:[#allocation9] sm:$0xff]  ;;  %v188_v28 = vld [vmem:[#allocation12 + $0x8] sm:$0xff]  ;;  %s267_s28 = sshll.u32 %s547_s3, 4  ;;  %s268_s28 = int_to_ptr.vmem [resolvable:$true] %s267_s28 }
  0x4d   :  { %v164_v13 = vsub.f32 %v163_v7, %v152_v3  ;;  %v248_v32 = vadd.f32 %v188_v28, %v187_v27  ;;  %s442_s10 = scalar_lea.vmem %s268_s28, 16  ;;  %s446_s11 = scalar_lea.vmem %s268_s28, 32 }
  0x4e   :  { %vm151_vm1 = vcmp.lt.s32.totalorder %v147_v2, 96  ;;  %p443_p4 = scmp.ne.s32.totalorder %s268_s28, %s442_s10  ;;  %p447_p5 = scmp.lt.s32.totalorder %s268_s28, %s268_s28 }
  0x4f   :  { %v167_v8 = vsel %vm151_vm1, %v166_v6, 1.0  ;;  %v157_v9 = vsel %vm151_vm1, %v154_v5, 0.0  ;;  %v165_v15 = vsel %vm151_vm1, %v164_v13, 0.0  ;;  %p448_p6 = scmp.lt.s32.totalorder %s446_s11, %s442_s10 }
  0x50   :  { %v168_v11 = vmul.f32 %v167_v8, %v167_v8  ;;  %350 = vlog2.f32 %v167_v8  ;;  %v159_v12 = vmul.f32 %v157_v9, %v157_v9  ;;  %v171_v16 = vmul.f32 %v165_v15, %v165_v15 }
  0x51   :  { %p449_p7 = por %p448_p6, %p447_p5 }
  0x52   :  { %v158_v10 = vld [vmem:[#allocation2] sm:$0xff]  ;;  %352 = vrcp.f32 %v168_v11  ;;  %v170_v22 = vld [vmem:[#allocation3] sm:$0xff] }
  0x53   :  { %v160_v14 = vadd.f32 %v159_v12, %v158_v10  ;;  %v175_v18 = vld [vmem:[#allocation4] sm:$0xff]  ;;  %p450_p8 = pnand %p449_p7, %p443_p4 }
  0x55   :  { %162 = vst.msk [vmem:[#allocation2] sm:$0xff] %vm140_vm0, %v160_v14 }
  0x5a   :  { %v351_v17 = vpop.eup %350 }
  0x5b   :  { %v177_v19 = vmul.f32 0.6931472, %v351_v17 }
  0x5c   :  { %v353_v20 = vpop.eup %352  ;;  %v204_v21 = vld [vmem:[#allocation2] sm:$0xff] }
  0x5d   :  { %v205_v23 = vsel %vm140_vm0, %v204_v21, 0.0  ;;  %v178_v24 = vadd.f32 %v177_v19, %v175_v18  ;;  %v172_v25 = vmul.f32 %v353_v20, %v171_v16 }
  0x5e   :  { %206 = vadd.xlane.f32.xlu0 %v205_v23 }
  0x5f   :  { %179 = vst.msk [vmem:[#allocation4] sm:$0xff] %vm140_vm0, %v178_v24  ;;  %v173_v26 = vadd.f32 %v172_v25, %v170_v22 }
  0x61   :  { %174 = vst.msk [vmem:[#allocation3] sm:$0xff] %vm140_vm0, %v173_v26 }
  0x66   :  { %v232_v29 = vld [vmem:[#allocation4] sm:$0xff] }
  0x67   :  { %v233_v30 = vsel %vm140_vm0, %v232_v29, 0.0 }
  0x68   :  { %234 = vadd.xlane.f32.xlu1 %v233_v30  ;;  %v218_v31 = vld [vmem:[#allocation3] sm:$0xff] }
  0x69   :  { %v219_v33 = vsel %vm140_vm0, %v218_v31, 0.0 }
  0x6a   :  { %220 = vadd.xlane.f32.xlu0 %v219_v33 }
  0x6c   :  { %249 = vadd.xlane.f32.xlu1 %v248_v32 }
  0xeb   :  { %v207_v34 = vpop.xlane.xlu0 %206 }
  0xec   :  { %v208_v35 = vrot.slane %v207_v34, 4 }
  0xee   :  { %v209_v36 = vadd.f32 %v208_v35, %v207_v34 }
  0xf0   :  { %v210_v37 = vrot.slane %v209_v36, 2 }
  0xf2   :  { %v211_v38 = vadd.f32 %v210_v37, %v209_v36 }
  0xf4   :  { %v212_v39 = vrot.slane %v211_v38, 1 }
  0xf5   :  { %v235_v40 = vpop.xlane.xlu1 %234 }
  0xf6   :  { %v236_v41 = vrot.slane %v235_v40, 4  ;;  %v213_v42 = vadd.f32 %v212_v39, %v211_v38 }
  0xf7   :  { %v221_v43 = vpop.xlane.xlu0 %220 }
  0xf8   :  { %v237_v44 = vadd.f32 %v236_v41, %v235_v40  ;;  %v222_v45 = vrot.slane %v221_v43, 4  ;;  %333 = vpush %v213_v42 }
  0xf9   :  { %v250_v46 = vpop.xlane.xlu1 %249 }
  0xfa   :  { %v238_v47 = vrot.slane %v237_v44, 2  ;;  %v223_v48 = vadd.f32 %v222_v45, %v221_v43  ;;  %v251_v49 = vrot.slane %v250_v46, 4 }
  0xfc   :  { %v224_v50 = vrot.slane %v223_v48, 2  ;;  %v252_v51 = vadd.f32 %v251_v49, %v250_v46  ;;  %v239_v52 = vadd.f32 %v238_v47, %v237_v44 }
  0xfe   :  { %v225_v53 = vadd.f32 %v224_v50, %v223_v48  ;;  %v253_v54 = vrot.slane %v252_v51, 2  ;;  %v240_v55 = vrot.slane %v239_v52, 1 }
 0x100   :  { %v254_v56 = vadd.f32 %v253_v54, %v252_v51  ;;  %v226_v57 = vrot.slane %v225_v53, 1  ;;  %v241_v60 = vadd.f32 %v240_v55, %v239_v52 }
 0x102   :  { %v227_v58 = vadd.f32 %v226_v57, %v225_v53  ;;  %v255_v59 = vrot.slane %v254_v56, 1 }
 0x104   :  { %335 = vpush %v227_v58  ;;  %v256_v61 = vadd.f32 %v255_v59, %v254_v56 }
 0x105   :  { %337 = vpush %v241_v60 }
 0x106   :  { %339 = vpush %v256_v61 }
 0x129   :  { %s334_s29 = spop %333 }
 0x12a   :  { %s215_s9 = smul.f32 0.0006510417, %s334_s29 }
 0x12c   :  { %v216_v62 = vstv %s215_s9 }
 0x12d   :  { %217 = vst [vmem:[#allocation14] sm:$0x1] %v216_v62 }
 0x12e   :  { %453 = shalt.err (!%p450_p8)
}
 0x12f   :  { %s454_s14 = scalar_lea.hbm %s736_s5, 16 }
 0x130   :  { %p455_p9 = scmp.ne.s32.totalorder %s736_s5, %s454_s14  ;;  %p458_p10 = scmp.lt.u32.totalorder %s454_s14, %s736_s5 }
 0x132   :  { %p460_p11 = pnand %p458_p10, %p455_p9 }
 0x134   :  { %463 = shalt.err (!%p460_p11)
}
 0x135   :  { %270 = dma.vmem_to_hbm [thread:$0]  %s268_s28, 16, %s736_s5, [#allocation8]  }
 0x136   :  { %s548_s19 = smov [#allocation15]   ;;  %s549_s21 = smov [#allocation17]  }
 0x137   :  { %s277_s20 = sshll.u32 %s548_s19, 4  ;;  %s287_s22 = sshll.u32 %s549_s21, 4  ;;  %s671_s20 = int_to_ptr.vmem [resolvable:$true] %s277_s20  ;;  %s673_s22 = int_to_ptr.vmem [resolvable:$true] %s287_s22 }
 0x138   :  { %s336_s23 = spop %335  ;;  %s550_s24 = smov [#allocation18]  }
 0x139   :  { %s297_s25 = sshll.u32 %s550_s24, 4  ;;  %s229_s26 = smul.f32 0.0006510417, %s336_s23  ;;  %s675_s25 = int_to_ptr.vmem [resolvable:$true] %s297_s25 }
 0x13a   :  { %s338_s2 = spop %337  ;;  %s464_s5 = scalar_lea.vmem %s671_s20, 16 }
 0x13b   :  { %s243_s1 = smul.f32 0.0013020834, %s338_s2  ;;  %s340_s4 = spop %339  ;;  %v230_v63 = vstv %s229_s26 }
 0x13c   :  { %s258_s27 = smul.f32 4.8828124e-06, %s340_s4  ;;  %231 = vst [vmem:[#allocation15] sm:$0x1] %v230_v63  ;;  %p465_p12 = scmp.ne.s32.totalorder %s671_s20, %s464_s5 }
 0x13d   :  { %v244_v0 = vstv %s243_s1  ;;  %s468_s3 = scalar_lea.vmem %s671_s20, 32  ;;  %p469_p13 = scmp.lt.s32.totalorder %s671_s20, %s671_s20 }
 0x13e   :  { %245 = vst [vmem:[#allocation17] sm:$0x1] %v244_v0  ;;  %v259_v1 = vstv %s258_s27  ;;  %p470_p0 = scmp.lt.s32.totalorder %s468_s3, %s464_s5 }
 0x140   :  { %p471_p1 = por %p470_p0, %p469_p13 }
 0x142   :  { %p472_p2 = pnand %p471_p1, %p465_p12 }
 0x144   :  { %475 = shalt.err (!%p472_p2)
}
 0x145   :  { %s476_s9 = scalar_lea.hbm %s737_s6, 16 }
 0x146   :  { %p477_p3 = scmp.ne.s32.totalorder %s737_s6, %s476_s9  ;;  %p480_p4 = scmp.lt.u32.totalorder %s476_s9, %s737_s6 }
 0x148   :  { %p482_p5 = pnand %p480_p4, %p477_p3 }
 0x14a   :  { %485 = shalt.err (!%p482_p5)
}
 0x14b   :  { %280 = dma.vmem_to_hbm [thread:$0]  %s671_s20, 16, %s737_s6, [#allocation16]   ;;  %260 = vst [vmem:[#allocation18] sm:$0x1] %v259_v1 }
 0x14c   :  { %s486_s16 = scalar_lea.vmem %s673_s22, 16  ;;  %s490_s17 = scalar_lea.vmem %s673_s22, 32 }
 0x14d   :  { %p487_p6 = scmp.ne.s32.totalorder %s673_s22, %s486_s16  ;;  %p491_p7 = scmp.lt.s32.totalorder %s673_s22, %s673_s22 }
 0x14e   :  { %p492_p8 = scmp.lt.s32.totalorder %s490_s17, %s486_s16 }
 0x150   :  { %p493_p9 = por %p492_p8, %p491_p7 }
 0x152   :  { %p494_p10 = pnand %p493_p9, %p487_p6 }
 0x154   :  { %497 = shalt.err (!%p494_p10)
}
 0x155   :  { %s498_s18 = scalar_lea.hbm %s738_s7, 16 }
 0x156   :  { %p499_p11 = scmp.ne.s32.totalorder %s738_s7, %s498_s18  ;;  %p502_p12 = scmp.lt.u32.totalorder %s498_s18, %s738_s7 }
 0x158   :  { %p504_p13 = pnand %p502_p12, %p499_p11 }
 0x15a   :  { %507 = shalt.err (!%p504_p13)
}
 0x15b   :  { %290 = dma.vmem_to_hbm [thread:$0]  %s673_s22, 16, %s738_s7, [#allocation16]  }
 0x15c   :  { %s508_s26 = scalar_lea.vmem %s675_s25, 16  ;;  %s512_s2 = scalar_lea.vmem %s675_s25, 32 }
 0x15d   :  { %p509_p0 = scmp.ne.s32.totalorder %s675_s25, %s508_s26  ;;  %p513_p1 = scmp.lt.s32.totalorder %s675_s25, %s675_s25 }
 0x15e   :  { %p514_p2 = scmp.lt.s32.totalorder %s512_s2, %s508_s26 }
 0x160   :  { %p515_p3 = por %p514_p2, %p513_p1 }
 0x162   :  { %p516_p4 = pnand %p515_p3, %p509_p0 }
 0x164   :  { %519 = shalt.err (!%p516_p4)
}
 0x165   :  { %s520_s27 = scalar_lea.hbm %s739_s8, 16 }
 0x166   :  { %p521_p5 = scmp.ne.s32.totalorder %s739_s8, %s520_s27  ;;  %p524_p6 = scmp.lt.u32.totalorder %s520_s27, %s739_s8 }
 0x168   :  { %p526_p7 = pnand %p524_p6, %p521_p5 }
 0x16a   :  { %529 = shalt.err (!%p526_p7)
}
 0x16b   :  { %300 = dma.vmem_to_hbm [thread:$0]  %s675_s25, 16, %s739_s8, [#allocation19]  }
 0x16c   :  { %536 = dma.done.wait [#allocation8], 16  }
 0x16d   :  { %537 = vsyncadd [#allocation8], 4294967280 }
 0x16e   :  { %538 = dma.done.wait [#allocation16], 32  }
 0x16f   :  { %539 = vsyncadd [#allocation16], 4294967264 }
 0x170   :  { %540 = dma.done.wait [#allocation19], 16  }
 0x171   :  { %541 = vsyncadd [#allocation19], 4294967280 }
 0x172   :  { %313 = vsyncpa [#allocation7], 1 }
 0x173   :  { %314 = vsyncpa [#allocation10], 1 }
 0x174   :  { %315 = vsyncpa [#allocation13], 1 }
 0x175   :  { %316 = vsyncpa [#allocation8], 1 }
 0x176   :  { %317 = vsyncpa [#allocation16], 1 }
 0x177   :  { %318 = vsyncpa [#allocation19], 1 }

</bundles_post_ra>
